<compile_context>
chip_gen: v5e
topology: v5e:2x2
jax: 0.10.0
libtpu: 0.0.40
codegen_flags: <defaults>
</compile_context>

<pallas_src>
import functools

import jax
import jax.numpy as jnp
from jax import lax
from jax.experimental import pallas as pl
from jax.experimental.pallas import tpu as pltpu

_LANE = 128


def _cdiv(a, b):
    return -(-a // b)


def _round_up(a, b):
    return _cdiv(a, b) * b


def _sublane(dtype):
    # Sub-32-bit dtypes pack along sublanes: the native second-minor tile is
    # 8 * (4 / itemsize) rows (8 for f32, 16 for bf16, 32 for int8/fp8).
    return 8 * max(1, 4 // jnp.dtype(dtype).itemsize)


def _vmem_capacity_bytes():
    try:
        cap = int(pltpu.get_tpu_info().vmem_capacity_bytes)
        if cap > 0:
            return cap
    except Exception:
        pass
    # Conservative fallback: v7x has 64 MiB of VMEM per TensorCore.
    return 64 << 20


# --------------------------------------------------------------------------
# Kernels
# --------------------------------------------------------------------------
def _ce_single_col_kernel(x_ref, t_ref, out_ref, *, n_rows, row_tile):
    """Whole class dim in one column tile: no scratch accumulator at all."""
    x = x_ref[...].astype(jnp.float32)
    t = t_ref[...].astype(jnp.float32)
    contrib = -t * jnp.log(x)  # elementwise: VPU mul/neg + EUP log

    if n_rows % row_tile != 0:
        i = pl.program_id(0)
        rows = i * row_tile + lax.broadcasted_iota(jnp.int32, contrib.shape, 0)
        contrib = jnp.where(rows < n_rows, contrib, 0.0)

    # One cross-sublane + cross-lane (XLU) reduce per row block -> scalar.
    out_ref[...] = jnp.sum(contrib, keepdims=True)


def _ce_class_tiled_kernel(x_ref, t_ref, out_ref, acc_ref, *,
                           n_rows, n_cols, row_tile, col_tile):
    """Vocab-scale C: class axis is tiled (innermost, reduction axis)."""
    i = pl.program_id(0)
    j = pl.program_id(1)

    x = x_ref[...].astype(jnp.float32)
    t = t_ref[...].astype(jnp.float32)
    contrib = -t * jnp.log(x)

    mask = None
    if n_rows % row_tile != 0:
        rows = i * row_tile + lax.broadcasted_iota(jnp.int32, contrib.shape, 0)
        mask = rows < n_rows
    if n_cols % col_tile != 0:
        cols = j * col_tile + lax.broadcasted_iota(jnp.int32, contrib.shape, 1)
        cmask = cols < n_cols
        mask = cmask if mask is None else (mask & cmask)
    if mask is not None:
        contrib = jnp.where(mask, contrib, 0.0)

    # One cross-sublane reduce per inner step into a lane-dense (1, col_tile)
    # accumulator (XLU slot is otherwise idle in this kernel).
    partial = jnp.sum(contrib, axis=0, keepdims=True)

    @pl.when(j == 0)
    def _init():
        acc_ref[...] = partial

    @pl.when(j > 0)
    def _accum():
        acc_ref[...] += partial

    @pl.when(j == pl.num_programs(1) - 1)
    def _finalize():
        out_ref[...] = jnp.sum(acc_ref[...], keepdims=True)


# --------------------------------------------------------------------------
# Tile selection
# --------------------------------------------------------------------------
def _choose_tiles(n_rows, n_cols, in_itemsize, budget_bytes, sub):
    """Pick (row_tile, col_tile) so the streaming working set fits in
    `budget_bytes` of VMEM.  Per (lane-padded) tile element we hold:
      2 inputs x 2 pipeline buffers x itemsize      (DMA'd blocks)
      + ~20 B of f32 elementwise intermediates      (log / product / mask)
    """
    c_alloc_full = _round_up(n_cols, _LANE)
    per_elem = 4 * in_itemsize + 20

    if per_elem * c_alloc_full * sub <= budget_bytes:
        # Whole class dim fits in one column tile.  Use the true C so the
        # last-dim block equals the full array dim (no column masking).
        col_tile = n_cols
        c_alloc = c_alloc_full
    else:
        # Vocab-scale C: tile the class dim so at least `sub` rows still fit.
        col_tile = max(_LANE,
                       (budget_bytes // (per_elem * sub * _LANE)) * _LANE)
        c_alloc = col_tile

    max_rows = (budget_bytes // (per_elem * c_alloc)) // sub * sub
    row_tile = max(sub, min(max_rows, 4096))
    # No point in a row tile larger than the (sublane-rounded) batch...
    row_tile = min(row_tile, _round_up(n_rows, sub))
    # ...and keep >= 2 row blocks whenever possible so the "parallel" row
    # axis can shard across v7x's two TensorCores.
    if n_rows >= 2 * sub:
        row_tile = min(row_tile, max(sub, _round_up(_cdiv(n_rows, 2), sub)))
    return row_tile, col_tile


# --------------------------------------------------------------------------
# Wrapper
# --------------------------------------------------------------------------
def sig_soft_target_cross_entropy(x, target, *, vmem_tile_budget_bytes=None):
    """x, target: [N, C] float arrays (any float dtype; math is f32).
    Returns the scalar f32 loss  mean_n( sum_c( -target * log(x) ) )."""
    assert x.shape == target.shape and x.ndim == 2
    n, c = x.shape
    itemsize = jnp.dtype(x.dtype).itemsize

    vmem_cap = _vmem_capacity_bytes()
    if vmem_tile_budget_bytes is None:
        # ~40% of physical VMEM for the streaming working set.
        vmem_tile_budget_bytes = int(0.4 * vmem_cap)

    sub = _sublane(x.dtype)
    row_tile, col_tile = _choose_tiles(n, c, itemsize,
                                       vmem_tile_budget_bytes, sub)
    grid_rows = _cdiv(n, row_tile)

    # Generation-aware VMEM limit: budget + margin, but never above ~90% of
    # physical VMEM (64 MiB/TC on v7x; 128 MiB on v5e/v6e).
    vmem_limit = int(min(vmem_tile_budget_bytes + (16 << 20),
                         int(0.9 * vmem_cap)))
    vmem_limit = max(vmem_limit, 16 << 20)

    cost = pl.CostEstimate(
        flops=3 * n * c,
        transcendentals=n * c,
        bytes_accessed=2 * n * c * itemsize + grid_rows * 4,
    )

    if col_tile == c:
        kernel = functools.partial(_ce_single_col_kernel,
                                   n_rows=n, row_tile=row_tile)
        grid_spec = pltpu.PrefetchScalarGridSpec(
            num_scalar_prefetch=0,
            grid=(grid_rows,),
            in_specs=[
                pl.BlockSpec((row_tile, c), lambda i: (i, 0)),
                pl.BlockSpec((row_tile, c), lambda i: (i, 0)),
            ],
            out_specs=pl.BlockSpec((1, 1), lambda i: (i, 0)),
        )
        dims = ("parallel",)
    else:
        grid_cols = _cdiv(c, col_tile)
        kernel = functools.partial(_ce_class_tiled_kernel,
                                   n_rows=n, n_cols=c,
                                   row_tile=row_tile, col_tile=col_tile)
        grid_spec = pltpu.PrefetchScalarGridSpec(
            num_scalar_prefetch=0,
            grid=(grid_rows, grid_cols),
            in_specs=[
                pl.BlockSpec((row_tile, col_tile), lambda i, j: (i, j)),
                pl.BlockSpec((row_tile, col_tile), lambda i, j: (i, j)),
            ],
            out_specs=pl.BlockSpec((1, 1), lambda i, j: (i, 0)),
            scratch_shapes=[pltpu.VMEM((1, col_tile), jnp.float32)],
        )
        dims = ("parallel", "arbitrary")

    partials = pl.pallas_call(
        kernel,
        out_shape=jax.ShapeDtypeStruct((grid_rows, 1), jnp.float32),
        grid_spec=grid_spec,
        compiler_params=pltpu.CompilerParams(
            dimension_semantics=dims,
            vmem_limit_bytes=vmem_limit,
        ),
        cost_estimate=cost,
    )(x, target)

    # Tiny final reduce + mean over the true (unmasked) row count.
    return jnp.sum(partials) / jnp.float32(n)


if __name__ == "__main__":
    key = jax.random.PRNGKey(0)
    kx, kt = jax.random.split(key)

    # Small, deliberately non-(8,128)-aligned shapes to exercise tail masking.
    N, C = 13, 200
    logits = jax.random.normal(kx, (N, C), dtype=jnp.float32)
    x = jax.nn.softmax(logits, axis=-1)          # probabilities in (0, 1)
    t_logits = jax.random.normal(kt, (N, C), dtype=jnp.float32)
    target = jax.nn.softmax(t_logits, axis=-1)   # soft targets per row

    ref = jnp.mean(jnp.sum(-target * jnp.log(x), axis=-1))

    # 1) Default (big-tile) path: whole class dim in one column tile,
    #    no scratch accumulator, per-row-block scalar output.
    loss = jax.block_until_ready(sig_soft_target_cross_entropy(x, target))
    assert jnp.allclose(loss, ref, rtol=1e-5, atol=1e-5), (loss, ref)

    # 2) Tiny-budget path: forces class-dim tiling + multiple row blocks,
    #    exercising row/column tail masks and the lane-dense accumulator.
    loss_small = jax.block_until_ready(
        sig_soft_target_cross_entropy(x, target,
                                      vmem_tile_budget_bytes=16 * 1024))
    assert jnp.allclose(loss_small, ref, rtol=1e-5, atol=1e-5), (loss_small, ref)

    # 3) bf16 inputs: exercises the dtype-aware (16-row) sublane rounding and
    #    the in-kernel f32 upcast.
    xb = x.astype(jnp.bfloat16)
    tb = target.astype(jnp.bfloat16)
    ref_b = jnp.mean(jnp.sum(-tb.astype(jnp.float32)
                             * jnp.log(xb.astype(jnp.float32)), axis=-1))
    loss_b = jax.block_until_ready(sig_soft_target_cross_entropy(xb, tb))
    assert jnp.allclose(loss_b, ref_b, rtol=1e-5, atol=1e-5), (loss_b, ref_b)

    print("KERNEL_OK")
</pallas_src>

<mosaic_0001>
module attributes {stable_mosaic.version = 11 : i64} {
  func.func @_ce_single_col_kernel(%arg0: i32, %arg1: memref<16x200xf32, #tpu.memory_space<vmem>>, %arg2: memref<16x200xf32, #tpu.memory_space<vmem>>, %arg3: memref<1x1xf32, #tpu.memory_space<vmem>>) attributes {dimension_semantics = [#tpu.dimension_semantics<parallel>], iteration_bounds = array<i64: 1>, scalar_prefetch = 0 : i64, scratch_operands = 0 : i64, tpu.core_type = #tpu.core_type<tc>, window_params = [{transform_indices = @transform_0, window_bounds = array<i64: 16, 200>}, {transform_indices = @transform_1, window_bounds = array<i64: 16, 200>}, {transform_indices = @transform_2, window_bounds = array<i64: 1, 1>}]} {
    %c0 = arith.constant 0 : index
    %c0_0 = arith.constant 0 : index
    %0 = vector.load %arg1[%c0, %c0_0] : memref<16x200xf32, #tpu.memory_space<vmem>>, vector<16x200xf32>
    %c0_1 = arith.constant 0 : index
    %c0_2 = arith.constant 0 : index
    %1 = vector.load %arg2[%c0_1, %c0_2] : memref<16x200xf32, #tpu.memory_space<vmem>>, vector<16x200xf32>
    %cst = arith.constant 0.000000e+00 : f32
    %2 = vector.broadcast %cst : f32 to vector<16x200xf32>
    %3 = arith.subf %2, %1 : vector<16x200xf32>
    %4 = math.log %0 : vector<16x200xf32>
    %5 = arith.mulf %3, %4 : vector<16x200xf32>
    %c16_i32 = arith.constant 16 : i32
    %6 = arith.muli %arg0, %c16_i32 : i32
    %7 = tpu.iota {dimensions = array<i32: 0>} : vector<16x200xi32>
    %8 = vector.broadcast %6 : i32 to vector<16x200xi32>
    %9 = arith.addi %8, %7 : vector<16x200xi32>
    %c13_i32 = arith.constant 13 : i32
    %10 = vector.broadcast %c13_i32 : i32 to vector<16x200xi32>
    %11 = arith.cmpi slt, %9, %10 : vector<16x200xi32>
    %cst_3 = arith.constant 0.000000e+00 : f32
    %12 = vector.broadcast %cst_3 : f32 to vector<16x200xf32>
    %13 = arith.select %11, %5, %12 : vector<16x200xi1>, vector<16x200xf32>
    %14 = vector.shape_cast %13 : vector<16x200xf32> to vector<1x16x200xf32>
    %cst_4 = arith.constant dense<0.000000e+00> : vector<1xf32>
    %15 = vector.multi_reduction <add>, %14, %cst_4 [1, 2] : vector<1x16x200xf32> to vector<1xf32>
    %16 = vector.shape_cast %15 : vector<1xf32> to vector<1x1x1xf32>
    %17 = vector.extract %16[0, 0, 0] : f32 from vector<1x1x1xf32>
    %18 = vector.broadcast %17 : f32 to vector<1x1xf32>
    %c0_5 = arith.constant 0 : index
    %c0_6 = arith.constant 0 : index
    %19 = vector.load %arg3[%c0_5, %c0_6] : memref<1x1xf32, #tpu.memory_space<vmem>>, vector<1x1xf32>
    tpu.vector_store %arg3[%c0_5, %c0_6], %18 {strides = array<i32>} : memref<1x1xf32, #tpu.memory_space<vmem>>, vector<1x1xf32>,
    return
  }
  func.func @transform_0(%arg0: i32) -> (i32, i32) {
    %c0_i32 = arith.constant 0 : i32
    %c0_i32_0 = arith.constant 0 : i32
    return %arg0, %c0_i32 : i32, i32
  }
  func.func @transform_1(%arg0: i32) -> (i32, i32) {
    %c0_i32 = arith.constant 0 : i32
    %c0_i32_0 = arith.constant 0 : i32
    return %arg0, %c0_i32 : i32, i32
  }
  func.func @transform_2(%arg0: i32) -> (i32, i32) {
    %c0_i32 = arith.constant 0 : i32
    %c0_i32_0 = arith.constant 0 : i32
    return %arg0, %c0_i32 : i32, i32
  }
}

</mosaic_0001>

<bundles_post_ra>
// kernel: tpu_custom_call.1
= control target key start
LH: loop header
LB: loop body
LE: loop exit
PB: predicated region body
PF: predicated region fallthrough
CT: control target
= control target key end

     0   :  { %7 = vsyncpa [#allocation3], 0  ;;  %s239_s0 = inlined_call_operand.hbm [shape: f32[13,200], index: 0, kind: input, shape index: {}]   ;;  %s240_s1 = inlined_call_operand.hbm [shape: f32[13,200], index: 1, kind: input, shape index: {}]   ;;  %s241_s2 = inlined_call_operand.hbm [shape: f32[1,1], index: 2, kind: output, shape index: {}]  }
   0x1   :  { %8 = vsyncpa [#allocation6], 0 }
   0x2   :  { %9 = vsyncpa [#allocation4], 0  ;;  %s14_s11 = sshll.u32 %s239_s0, 4  ;;  %s210_s12 = smov [#allocation2]   ;;  %s15_s11 = int_to_ptr.hbm [resolvable:$true] %s14_s11 }
   0x3   :  { %s16_s13 = sshll.u32 %s210_s12, 4  ;;  %s27_s16 = sshll.u32 %s240_s1, 4  ;;  %s17_s13 = int_to_ptr.vmem [resolvable:$true] %s16_s13  ;;  %s28_s16 = int_to_ptr.hbm [resolvable:$true] %s27_s16 }
   0x4   :  { %s211_s17 = smov 256   ;;  %s212_s18 = smov 16  }
   0x5   :  { %22 = dma.hbm_to_vmem [thread:$0]  %s15_s11, 512, %s17_s13, [#allocation3], %s211_s17, %s211_s17, %s212_s18  }
   0x6   :  { %s213_s19 = smov [#allocation5]  }
   0x7   :  { %s29_s20 = sshll.u32 %s213_s19, 4  ;;  %s30_s20 = int_to_ptr.vmem [resolvable:$true] %s29_s20 }
   0x8   :  { %35 = dma.hbm_to_vmem [thread:$0]  %s28_s16, 512, %s30_s20, [#allocation6], %s211_s17, %s211_s17, %s212_s18  }
   0x9   :  { %204 = dma.done.wait [#allocation3], 512  }
   0xa   :  { %205 = vsyncadd [#allocation3], 4294966784 }
   0xb   :  { %206 = dma.done.wait [#allocation6], 512  }
   0xc   :  { %207 = vsyncadd [#allocation6], 4294966784  ;;  %v69_v0 = vlaneseq  ;;  %v44_v1 = vld [vmem:[#allocation2] sm:$0xff]  ;;  %v45_v2 = vld [vmem:[#allocation2 + $0x8] sm:$0xff]  ;;  %vm81_vm0 = vcmask 588800   ;;  %s214_s0 = smov [#allocation7]  }
   0xd   :  { %v46_v3 = vld [vmem:[#allocation2 + $0x10] sm:$0xff]  ;;  %v47_v4 = vld [vmem:[#allocation2 + $0x18] sm:$0xff]  ;;  %124 = vlog2.f32 %v44_v1  ;;  %v48_v5 = vld [vmem:[#allocation5] sm:$0xff]  ;;  %s104_s1 = sshll.u32 %s214_s0, 4  ;;  %s106_s23 = sshll.u32 %s241_s2, 4  ;;  %vm97_vm2 = vcmask 0   ;;  %s105_s1 = int_to_ptr.vmem [resolvable:$true] %s104_s1  ;;  %s107_s23 = int_to_ptr.hbm [resolvable:$true] %s106_s23 }
   0xe   :  { %126 = vlog2.f32 %v45_v2  ;;  %v70_v6 = vshrl.u32 %v69_v0, 7  ;;  %v49_v7 = vld [vmem:[#allocation5 + $0x8] sm:$0xff]  ;;  %v50_v8 = vld [vmem:[#allocation5 + $0x10] sm:$0xff]  ;;  %v51_v9 = vld [vmem:[#allocation5 + $0x18] sm:$0xff]  ;;  %v52_v10 = vsub.f32 0.0, %v48_v5 }
   0xf   :  { %128 = vlog2.f32 %v46_v3  ;;  %v53_v12 = vsub.f32 0.0, %v49_v7  ;;  %v54_v15 = vsub.f32 0.0, %v50_v8  ;;  %v55_v18 = vsub.f32 0.0, %v51_v9 }
  0x10   :  { %130 = vlog2.f32 %v47_v4  ;;  %v71_v13 = vadd.s32 8, %v70_v6 }
  0x12   :  { %vm76_vm1 = vcmp.lt.s32.totalorder %v71_v13, 13 }
  0x13   :  { %v125_v11 = vpop.eup %124 }
  0x14   :  { %v127_v14 = vpop.eup %126  ;;  %v57_v16 = vmul.f32 0.6931472, %v125_v11 }
  0x15   :  { %v129_v17 = vpop.eup %128  ;;  %v59_v19 = vmul.f32 0.6931472, %v127_v14 }
  0x16   :  { %v131_v20 = vpop.eup %130  ;;  %v61_v21 = vmul.f32 0.6931472, %v129_v17  ;;  %v64_v22 = vmul.f32 %v57_v16, %v52_v10 }
  0x17   :  { %v63_v23 = vmul.f32 0.6931472, %v131_v20  ;;  %v65_v24 = vmul.f32 %v59_v19, %v53_v12 }
  0x18   :  { %v66_v25 = vmul.f32 %v61_v21, %v54_v15 }
  0x19   :  { %v67_v26 = vmul.f32 %v63_v23, %v55_v18  ;;  %v82_v27 = vsel %vm81_vm0, %v65_v24, 0.0 }
  0x1a   :  { %v79_v28 = vsel %vm76_vm1, %v66_v25, 0.0  ;;  %v83_v29 = vadd.f32 %v82_v27, %v64_v22 }
  0x1b   :  { %v80_v30 = vsel %vm76_vm1, %v67_v26, 0.0 }
  0x1c   :  { %v84_v31 = vadd.f32 %v83_v29, %v79_v28  ;;  %v85_v32 = vsel %vm81_vm0, %v80_v30, 0.0 }
  0x1e   :  { %v86_v33 = vadd.f32 %v85_v32, %v84_v31 }
  0x20   :  { %87 = vadd.xlane.f32.xlu0 %v86_v33 }
  0x93   :  { %v88_v34 = vpop.xlane.xlu0 %87 }
  0x94   :  { %v89_v35 = vrot.slane %v88_v34, 4 }
  0x96   :  { %v90_v36 = vadd.f32 %v89_v35, %v88_v34 }
  0x98   :  { %v91_v37 = vrot.slane %v90_v36, 2 }
  0x9a   :  { %v92_v38 = vadd.f32 %v91_v37, %v90_v36 }
  0x9c   :  { %v93_v39 = vrot.slane %v92_v38, 1 }
  0x9e   :  { %v94_v40 = vadd.f32 %v93_v39, %v92_v38 }
  0xa0   :  { %117 = vpush %v94_v40 }
  0xd1   :  { %s118_s24 = spop %117 }
  0xd2   :  { %v96_v41 = vstv %s118_s24 }
  0xd3   :  { %98 = vst.msk [vmem:[#allocation7] sm:$0x1] %vm97_vm2, %v96_v41 }
  0xd4   :  { %109 = dma.vmem_to_hbm [thread:$0]  %s105_s1, 16, %s107_s23, [#allocation4]  }
  0xd5   :  { %208 = dma.done.wait [#allocation4], 16  }
  0xd6   :  { %209 = vsyncadd [#allocation4], 4294967280 }
  0xd7   :  { %114 = vsyncpa [#allocation3], 1 }
  0xd8   :  { %115 = vsyncpa [#allocation6], 1 }
  0xd9   :  { %116 = vsyncpa [#allocation4], 1 }

</bundles_post_ra>
